<compile_context>
chip_gen: v5e
topology: v5e:2x2
jax: 0.10.0
libtpu: 0.0.40
codegen_flags: <defaults>
</compile_context>

<pallas_src>
import jax
import jax.numpy as jnp
from jax import lax
from jax.experimental import pallas as pl
from jax.experimental.pallas import tpu as pltpu

_LANE = 128                          # lane width (last dim of every tile)
_TILE_BYTES = 2 << 20                # ~2 MiB per input per pipeline buffer
_NUM_PARTIALS = 5                    # [x, y, x*y, x*x, y*y]
_OUT_LANES = _NUM_PARTIALS * _LANE   # 640 (lane-dense output slab)


def _sub_rows(dtype):
    """Sublane chunk size so each inner load is one full packed vreg."""
    itemsize = jnp.dtype(dtype).itemsize
    return {4: 8, 2: 16, 1: 32}.get(itemsize, 8)


def _partial_sums_kernel(x_ref, y_ref, out_ref):
    """Fold one (tile_r, 128) block of x/y into f32 partial sums.

    Grid is (num_slices, steps_per_slice). Axis 0 is 'parallel' (one slice per
    TensorCore on v7x); axis 1 is the streaming reduction. out_ref is the
    per-slice (1, sub, 640) partial-sum slab and doubles as the accumulator —
    its block index depends only on axis 0, so it stays resident in VMEM
    across the reduction axis.
    """
    j = pl.program_id(1)
    sub = out_ref.shape[1]
    tile_r = x_ref.shape[0]
    n_chunks = tile_r // sub

    @pl.when(j == 0)
    def _init():
        out_ref[...] = jnp.zeros_like(out_ref)

    def body(c, carry):
        sx, sy, sxy, sx2, sy2 = carry
        off = pl.multiple_of(c * sub, sub)
        xs = x_ref[pl.ds(off, sub), :].astype(jnp.float32)
        ys = y_ref[pl.ds(off, sub), :].astype(jnp.float32)
        return (sx + xs, sy + ys, sxy + xs * ys, sx2 + xs * xs, sy2 + ys * ys)

    zeros = jnp.zeros((sub, _LANE), jnp.float32)
    sx, sy, sxy, sx2, sy2 = lax.fori_loop(
        0, n_chunks, body, (zeros,) * 5, unroll=min(8, n_chunks))

    # Five lane-aligned (sub, 128) read-modify-writes per grid step (tiny).
    out_ref[0, :, 0 * _LANE:1 * _LANE] += sx
    out_ref[0, :, 1 * _LANE:2 * _LANE] += sy
    out_ref[0, :, 2 * _LANE:3 * _LANE] += sxy
    out_ref[0, :, 3 * _LANE:4 * _LANE] += sx2
    out_ref[0, :, 4 * _LANE:5 * _LANE] += sy2


def _pearson_from_sums(sx, sy, sxy, sx2, sy2, t):
    num = t * sxy - sx * sy
    den = jnp.sqrt((t * sx2 - sx * sx) * (t * sy2 - sy * sy))
    return 1.0 - num / den           # den == 0 -> NaN, same as PyTorch


def neg_pearson_loss_mtts(predictions, targets):
    """JAX wrapper mirroring neg_Pearson_Loss_MTTS(predictions, targets)."""
    x = jnp.ravel(jnp.squeeze(predictions))       # shape ops only, no copies
    y = jnp.ravel(jnp.squeeze(targets))
    n = x.shape[0]
    if y.shape[0] != n:
        raise ValueError("predictions and targets must have the same element count")
    if x.dtype != y.dtype:
        dt = jnp.promote_types(x.dtype, y.dtype)
        x, y = x.astype(dt), y.astype(dt)

    t = jnp.float32(n)
    sub = _sub_rows(x.dtype)
    itemsize = jnp.dtype(x.dtype).itemsize
    rows_full = n // _LANE
    tile_r_cap = _TILE_BYTES // (_LANE * itemsize)            # 4096 f32 / 8192 bf16
    tile_r = min(tile_r_cap, (rows_full // sub) * sub)         # multiple of sub

    if tile_r == 0:
        # Tiny input: no full (sub, 128) block exists -> plain JAX reduction.
        xf, yf = x.astype(jnp.float32), y.astype(jnp.float32)
        return _pearson_from_sums(jnp.sum(xf), jnp.sum(yf), jnp.sum(xf * yf),
                                  jnp.sum(xf * xf), jnp.sum(yf * yf), t)

    block_elems = tile_r * _LANE
    total_blocks = n // block_elems                            # >= 1
    num_slices = 2 if total_blocks >= 2 else 1                 # per-TC slices (v7x)
    steps = total_blocks // num_slices
    blocks_used = num_slices * steps
    main = blocks_used * block_elems                           # block-aligned prefix

    rows_main = blocks_used * tile_r
    x_main = x[:main].reshape(rows_main, _LANE)
    y_main = y[:main].reshape(rows_main, _LANE)
    # TODO(synk): when n % block_elems != 0 XLA may materialize the prefix slice
    # as one extra HBM copy; a fully copy-free ragged path would need a manual
    # 1-D DMA pipeline (memory_space=pl.ANY) and is not worth the complexity here.

    partials = pl.pallas_call(
        _partial_sums_kernel,
        out_shape=jax.ShapeDtypeStruct((num_slices, sub, _OUT_LANES), jnp.float32),
        grid_spec=pltpu.PrefetchScalarGridSpec(
            num_scalar_prefetch=0,
            grid=(num_slices, steps),
            in_specs=[
                pl.BlockSpec((tile_r, _LANE), lambda s, j: (s * steps + j, 0)),
                pl.BlockSpec((tile_r, _LANE), lambda s, j: (s * steps + j, 0)),
            ],
            out_specs=pl.BlockSpec((1, sub, _OUT_LANES), lambda s, j: (s, 0, 0)),
        ),
        compiler_params=pltpu.CompilerParams(
            dimension_semantics=("parallel", "arbitrary"),
        ),
    )(x_main, y_main)

    # Combine per-slice, per-sublane, per-lane partials -> the five scalars.
    sums = jnp.sum(partials.reshape(num_slices, sub, _NUM_PARTIALS, _LANE),
                   axis=(0, 1, 3))
    sx, sy, sxy, sx2, sy2 = sums[0], sums[1], sums[2], sums[3], sums[4]

    if main < n:
        # Short unaligned tail (< 2 blocks) reduced with plain jnp sums.
        xt = x[main:].astype(jnp.float32)
        yt = y[main:].astype(jnp.float32)
        sx = sx + jnp.sum(xt)
        sy = sy + jnp.sum(yt)
        sxy = sxy + jnp.sum(xt * yt)
        sx2 = sx2 + jnp.sum(xt * xt)
        sy2 = sy2 + jnp.sum(yt * yt)

    return _pearson_from_sums(sx, sy, sxy, sx2, sy2, t)


def _reference(predictions, targets):
    x = jnp.ravel(jnp.squeeze(predictions)).astype(jnp.float32)
    y = jnp.ravel(jnp.squeeze(targets)).astype(jnp.float32)
    t = jnp.float32(x.shape[0])
    sx, sy = jnp.sum(x), jnp.sum(y)
    sxy, sx2, sy2 = jnp.sum(x * y), jnp.sum(x * x), jnp.sum(y * y)
    return 1.0 - (t * sxy - sx * sy) / jnp.sqrt(
        (t * sx2 - sx * sx) * (t * sy2 - sy * sy))


if __name__ == "__main__":
    key = jax.random.PRNGKey(0)
    loss_fn = jax.jit(neg_pearson_loss_mtts)

    # rPPG-style signal shapes exercising every code path:
    cases = [
        ((4, 512), jnp.float32),      # 2048 elems: single full block, no tail
        ((7, 300), jnp.float32),      # 2100 elems: kernel prefix + 52-elem jnp tail
        ((5, 30000), jnp.float32),    # 150k elems: large block + tail
        ((3, 400000), jnp.float32),   # 1.2M elems: two slices -> 'parallel' leading axis
        ((2, 600000), jnp.bfloat16),  # bf16 streaming path (16-row packed loads)
    ]
    keys = jax.random.split(key, len(cases))

    for k, (shape, dtype) in zip(keys, cases):
        k1, k2 = jax.random.split(k)
        predictions = jax.random.normal(k1, shape, dtype=jnp.float32)
        targets = 0.5 * predictions + 0.5 * jax.random.normal(k2, shape, dtype=jnp.float32)
        predictions = predictions.astype(dtype)
        targets = targets.astype(dtype)

        loss = jax.block_until_ready(loss_fn(predictions, targets))
        ref = jax.block_until_ready(_reference(predictions, targets))
        tol = 2e-2 if dtype == jnp.bfloat16 else 1e-3
        assert jnp.allclose(loss, ref, atol=tol, rtol=tol), (shape, dtype, loss, ref)

    print("KERNEL_OK")
</pallas_src>

<mosaic_0001>
module attributes {stable_mosaic.version = 11 : i64} {
  func.func @_partial_sums_kernel(%arg0: i32, %arg1: i32, %arg2: memref<16x128xf32, #tpu.memory_space<vmem>>, %arg3: memref<16x128xf32, #tpu.memory_space<vmem>>, %arg4: memref<1x8x640xf32, #tpu.memory_space<vmem>>) attributes {dimension_semantics = [#tpu.dimension_semantics<parallel>, #tpu.dimension_semantics<arbitrary>], iteration_bounds = array<i64: 1, 1>, scalar_prefetch = 0 : i64, scratch_operands = 0 : i64, tpu.core_type = #tpu.core_type<tc>, window_params = [{transform_indices = @transform_0, window_bounds = array<i64: 16, 128>}, {transform_indices = @transform_1, window_bounds = array<i64: 16, 128>}, {transform_indices = @transform_2, window_bounds = array<i64: 1, 8, 640>}]} {
    %c0_i32 = arith.constant 0 : i32
    %0 = arith.cmpi eq, %arg1, %c0_i32 : i32
    %1 = arith.extui %0 : i1 to i32
    %c0_i32_0 = arith.constant 0 : i32
    %2 = arith.cmpi ne, %1, %c0_i32_0 : i32
    scf.if %2 {
      %cst_32 = arith.constant 0.000000e+00 : f32
      %62 = vector.broadcast %cst_32 : f32 to vector<1x8x640xf32>
      %c0_33 = arith.constant 0 : index
      %c0_34 = arith.constant 0 : index
      %c0_35 = arith.constant 0 : index
      %63 = vector.load %arg4[%c0_33, %c0_34, %c0_35] : memref<1x8x640xf32, #tpu.memory_space<vmem>>, vector<1x8x640xf32>
      tpu.vector_store %arg4[%c0_33, %c0_34, %c0_35], %62 {strides = array<i32>} : memref<1x8x640xf32, #tpu.memory_space<vmem>>, vector<1x8x640xf32>,
    } else {
    }
    %cst = arith.constant 0.000000e+00 : f32
    %3 = vector.broadcast %cst : f32 to vector<8x128xf32>
    %c0_i32_1 = arith.constant 0 : i32
    %c8_i32 = arith.constant 8 : i32
    %4 = arith.muli %c0_i32_1, %c8_i32 : i32
    %5 = tpu.assume_multiple %4, 8 : i32
    %6 = arith.index_cast %5 : i32 to index
    %c0 = arith.constant 0 : index
    %7 = vector.load %arg2[%6, %c0] : memref<16x128xf32, #tpu.memory_space<vmem>>, vector<8x128xf32>
    %8 = arith.index_cast %5 : i32 to index
    %c0_2 = arith.constant 0 : index
    %9 = vector.load %arg3[%8, %c0_2] : memref<16x128xf32, #tpu.memory_space<vmem>>, vector<8x128xf32>
    %10 = arith.addf %3, %7 : vector<8x128xf32>
    %11 = arith.addf %3, %9 : vector<8x128xf32>
    %12 = arith.mulf %7, %9 : vector<8x128xf32>
    %13 = arith.addf %3, %12 : vector<8x128xf32>
    %14 = arith.mulf %7, %7 : vector<8x128xf32>
    %15 = arith.addf %3, %14 : vector<8x128xf32>
    %16 = arith.mulf %9, %9 : vector<8x128xf32>
    %17 = arith.addf %3, %16 : vector<8x128xf32>
    %c1_i32 = arith.constant 1 : i32
    %c8_i32_3 = arith.constant 8 : i32
    %18 = arith.muli %c1_i32, %c8_i32_3 : i32
    %19 = tpu.assume_multiple %18, 8 : i32
    %20 = arith.index_cast %19 : i32 to index
    %c0_4 = arith.constant 0 : index
    %21 = vector.load %arg2[%20, %c0_4] : memref<16x128xf32, #tpu.memory_space<vmem>>, vector<8x128xf32>
    %22 = arith.index_cast %19 : i32 to index
    %c0_5 = arith.constant 0 : index
    %23 = vector.load %arg3[%22, %c0_5] : memref<16x128xf32, #tpu.memory_space<vmem>>, vector<8x128xf32>
    %24 = arith.addf %10, %21 : vector<8x128xf32>
    %25 = arith.addf %11, %23 : vector<8x128xf32>
    %26 = arith.mulf %21, %23 : vector<8x128xf32>
    %27 = arith.addf %13, %26 : vector<8x128xf32>
    %28 = arith.mulf %21, %21 : vector<8x128xf32>
    %29 = arith.addf %15, %28 : vector<8x128xf32>
    %30 = arith.mulf %23, %23 : vector<8x128xf32>
    %31 = arith.addf %17, %30 : vector<8x128xf32>
    %c2_i32 = arith.constant 2 : i32
    %c0_6 = arith.constant 0 : index
    %c0_7 = arith.constant 0 : index
    %c0_8 = arith.constant 0 : index
    %32 = vector.load %arg4[%c0_6, %c0_7, %c0_8] : memref<1x8x640xf32, #tpu.memory_space<vmem>>, vector<1x8x128xf32>
    %33 = vector.shape_cast %32 : vector<1x8x128xf32> to vector<8x128xf32>
    %34 = arith.addf %33, %24 : vector<8x128xf32>
    %c0_9 = arith.constant 0 : index
    %c0_10 = arith.constant 0 : index
    %c0_11 = arith.constant 0 : index
    %35 = vector.load %arg4[%c0_9, %c0_10, %c0_11] : memref<1x8x640xf32, #tpu.memory_space<vmem>>, vector<1x8x128xf32>
    %36 = vector.shape_cast %35 : vector<1x8x128xf32> to vector<8x128xf32>
    %37 = vector.shape_cast %34 : vector<8x128xf32> to vector<1x8x128xf32>
    tpu.vector_store %arg4[%c0_9, %c0_10, %c0_11], %37 {strides = array<i32>} : memref<1x8x640xf32, #tpu.memory_space<vmem>>, vector<1x8x128xf32>,
    %c0_12 = arith.constant 0 : index
    %c0_13 = arith.constant 0 : index
    %c128 = arith.constant 128 : index
    %38 = vector.load %arg4[%c0_12, %c0_13, %c128] : memref<1x8x640xf32, #tpu.memory_space<vmem>>, vector<1x8x128xf32>
    %39 = vector.shape_cast %38 : vector<1x8x128xf32> to vector<8x128xf32>
    %40 = arith.addf %39, %25 : vector<8x128xf32>
    %c0_14 = arith.constant 0 : index
    %c0_15 = arith.constant 0 : index
    %c128_16 = arith.constant 128 : index
    %41 = vector.load %arg4[%c0_14, %c0_15, %c128_16] : memref<1x8x640xf32, #tpu.memory_space<vmem>>, vector<1x8x128xf32>
    %42 = vector.shape_cast %41 : vector<1x8x128xf32> to vector<8x128xf32>
    %43 = vector.shape_cast %40 : vector<8x128xf32> to vector<1x8x128xf32>
    tpu.vector_store %arg4[%c0_14, %c0_15, %c128_16], %43 {strides = array<i32>} : memref<1x8x640xf32, #tpu.memory_space<vmem>>, vector<1x8x128xf32>,
    %c0_17 = arith.constant 0 : index
    %c0_18 = arith.constant 0 : index
    %c256 = arith.constant 256 : index
    %44 = vector.load %arg4[%c0_17, %c0_18, %c256] : memref<1x8x640xf32, #tpu.memory_space<vmem>>, vector<1x8x128xf32>
    %45 = vector.shape_cast %44 : vector<1x8x128xf32> to vector<8x128xf32>
    %46 = arith.addf %45, %27 : vector<8x128xf32>
    %c0_19 = arith.constant 0 : index
    %c0_20 = arith.constant 0 : index
    %c256_21 = arith.constant 256 : index
    %47 = vector.load %arg4[%c0_19, %c0_20, %c256_21] : memref<1x8x640xf32, #tpu.memory_space<vmem>>, vector<1x8x128xf32>
    %48 = vector.shape_cast %47 : vector<1x8x128xf32> to vector<8x128xf32>
    %49 = vector.shape_cast %46 : vector<8x128xf32> to vector<1x8x128xf32>
    tpu.vector_store %arg4[%c0_19, %c0_20, %c256_21], %49 {strides = array<i32>} : memref<1x8x640xf32, #tpu.memory_space<vmem>>, vector<1x8x128xf32>,
    %c0_22 = arith.constant 0 : index
    %c0_23 = arith.constant 0 : index
    %c384 = arith.constant 384 : index
    %50 = vector.load %arg4[%c0_22, %c0_23, %c384] : memref<1x8x640xf32, #tpu.memory_space<vmem>>, vector<1x8x128xf32>
    %51 = vector.shape_cast %50 : vector<1x8x128xf32> to vector<8x128xf32>
    %52 = arith.addf %51, %29 : vector<8x128xf32>
    %c0_24 = arith.constant 0 : index
    %c0_25 = arith.constant 0 : index
    %c384_26 = arith.constant 384 : index
    %53 = vector.load %arg4[%c0_24, %c0_25, %c384_26] : memref<1x8x640xf32, #tpu.memory_space<vmem>>, vector<1x8x128xf32>
    %54 = vector.shape_cast %53 : vector<1x8x128xf32> to vector<8x128xf32>
    %55 = vector.shape_cast %52 : vector<8x128xf32> to vector<1x8x128xf32>
    tpu.vector_store %arg4[%c0_24, %c0_25, %c384_26], %55 {strides = array<i32>} : memref<1x8x640xf32, #tpu.memory_space<vmem>>, vector<1x8x128xf32>,
    %c0_27 = arith.constant 0 : index
    %c0_28 = arith.constant 0 : index
    %c512 = arith.constant 512 : index
    %56 = vector.load %arg4[%c0_27, %c0_28, %c512] : memref<1x8x640xf32, #tpu.memory_space<vmem>>, vector<1x8x128xf32>
    %57 = vector.shape_cast %56 : vector<1x8x128xf32> to vector<8x128xf32>
    %58 = arith.addf %57, %31 : vector<8x128xf32>
    %c0_29 = arith.constant 0 : index
    %c0_30 = arith.constant 0 : index
    %c512_31 = arith.constant 512 : index
    %59 = vector.load %arg4[%c0_29, %c0_30, %c512_31] : memref<1x8x640xf32, #tpu.memory_space<vmem>>, vector<1x8x128xf32>
    %60 = vector.shape_cast %59 : vector<1x8x128xf32> to vector<8x128xf32>
    %61 = vector.shape_cast %58 : vector<8x128xf32> to vector<1x8x128xf32>
    tpu.vector_store %arg4[%c0_29, %c0_30, %c512_31], %61 {strides = array<i32>} : memref<1x8x640xf32, #tpu.memory_space<vmem>>, vector<1x8x128xf32>,
    return
  }
  func.func @transform_0(%arg0: i32, %arg1: i32) -> (i32, i32) {
    %c1_i32 = arith.constant 1 : i32
    %0 = arith.muli %arg0, %c1_i32 : i32
    %1 = arith.addi %0, %arg1 : i32
    %c0_i32 = arith.constant 0 : i32
    %c0_i32_0 = arith.constant 0 : i32
    return %1, %c0_i32 : i32, i32
  }
  func.func @transform_1(%arg0: i32, %arg1: i32) -> (i32, i32) {
    %c1_i32 = arith.constant 1 : i32
    %0 = arith.muli %arg0, %c1_i32 : i32
    %1 = arith.addi %0, %arg1 : i32
    %c0_i32 = arith.constant 0 : i32
    %c0_i32_0 = arith.constant 0 : i32
    return %1, %c0_i32 : i32, i32
  }
  func.func @transform_2(%arg0: i32, %arg1: i32) -> (i32, i32, i32) {
    %c0_i32 = arith.constant 0 : i32
    %c0_i32_0 = arith.constant 0 : i32
    %c0_i32_1 = arith.constant 0 : i32
    return %arg0, %c0_i32, %c0_i32_0 : i32, i32, i32
  }
}

</mosaic_0001>

<bundles_post_ra>
// kernel: neg_pearson_loss_mtts.1
= control target key start
LH: loop header
LB: loop body
LE: loop exit
PB: predicated region body
PF: predicated region fallthrough
CT: control target
= control target key end

     0   :  { %s162_s0 = inlined_call_operand.vmem [shape: f32[16,128], index: 0, kind: input, shape index: {}]   ;;  %s163_s1 = inlined_call_operand.vmem [shape: f32[16,128], index: 1, kind: input, shape index: {}]   ;;  %s164_s2 = inlined_call_operand.vmem [shape: f32[1,8,640], index: 2, kind: output, shape index: {}]  }
   0x1   :  { %v64_v0 = vld [vmem:[%s162_s0] sm:$0xff]  ;;  %v117_v1 = vld [vmem:[%s162_s0 + $0x8] sm:$0xff] }
   0x2   :  { %v65_v2 = vld [vmem:[%s163_s1] sm:$0xff]  ;;  %v78_v3 = vadd.f32 %v117_v1, %v64_v0  ;;  %v118_v4 = vld [vmem:[%s163_s1 + $0x8] sm:$0xff]  ;;  %v70_v6 = vmul.f32 %v64_v0, %v64_v0  ;;  %v82_v7 = vmul.f32 %v117_v1, %v117_v1 }
   0x3   :  { %v68_v5 = vmul.f32 %v65_v2, %v64_v0  ;;  %v79_v8 = vadd.f32 %v118_v4, %v65_v2  ;;  %v80_v9 = vmul.f32 %v118_v4, %v117_v1  ;;  %v72_v10 = vmul.f32 %v65_v2, %v65_v2 }
   0x4   :  { %v84_v11 = vmul.f32 %v118_v4, %v118_v4  ;;  %v83_v12 = vadd.f32 %v82_v7, %v70_v6  ;;  %88 = vst [vmem:[%s164_s2] sm:$0xff] %v78_v3 }
   0x5   :  { %v81_v13 = vadd.f32 %v80_v9, %v68_v5  ;;  %91 = vst [vmem:[%s164_s2 + $0x8] sm:$0xff] %v79_v8 }
   0x6   :  { %v85_v14 = vadd.f32 %v84_v11, %v72_v10  ;;  %97 = vst [vmem:[%s164_s2 + $0x18] sm:$0xff] %v83_v12 }
   0x7   :  { %94 = vst [vmem:[%s164_s2 + $0x10] sm:$0xff] %v81_v13 }
   0x8   :  { %100 = vst [vmem:[%s164_s2 + $0x20] sm:$0xff] %v85_v14 }

</bundles_post_ra>
